<compile_context>
chip_gen: v6e
topology: v6e:2x2x1
jax: 0.10.0
libtpu: 0.0.40
codegen_flags: <defaults>
</compile_context>

<pallas_src>
import jax
import jax.numpy as jnp
from jax import lax
from jax.experimental import pallas as pl
from jax.experimental.pallas import tpu as pltpu


# ----------------------------------------------------------------------------
# Fused kernel.  Grid = (B, V // TILE_V); one batch row per outer step, one
# vocab tile per inner step.
#
#   j == 0:  ctx    = tanh(src_emb @ W_enc + b_enc)          (T_src, H)
#            scores = dot_general(tgt_emb, ctx, contract last dims)
#            probs  = softmax(scores)
#            h      = tgt_emb + probs @ ctx                   -> VMEM scratch
#   all j:   logits[:, j-tile] = h @ W_out[:, j-tile] + b_out[j-tile]
# ----------------------------------------------------------------------------
def _seq2seq_kernel(src_ref, tgt_ref, w_enc_ref, b_enc_ref,
                    w_out_ref, b_out_ref, o_ref, h_scratch):
    j = pl.program_id(1)

    @pl.when(j == 0)
    def _():
        # Encoder: (T_src, E) @ (E, H) on the MXU, tanh on the VPU/EUP.
        x = src_ref[...]                                        # (T_src, E)
        ctx = jnp.tanh(
            jnp.dot(x, w_enc_ref[...], preferred_element_type=jnp.float32)
            + b_enc_ref[...])                                   # (T_src, H)

        # Bridge is an identity State wrap around `ctx`; it stays in VMEM.
        e = tgt_ref[...]                                        # (T_tgt, H)

        # Attention scores: contract on the last dim of both operands —
        # no explicit transpose (MXU-direct, no XLU work).
        scores = lax.dot_general(
            e, ctx, (((1,), (1,)), ((), ())),
            preferred_element_type=jnp.float32)                 # (T_tgt, T_src)

        m = jnp.max(scores, axis=-1, keepdims=True)
        p = jnp.exp(scores - m)
        p = p * pl.reciprocal(jnp.sum(p, axis=-1, keepdims=True), approx=True)

        attn = jnp.dot(p, ctx, preferred_element_type=jnp.float32)  # (T_tgt, H)
        h_scratch[...] = e + attn

    # Output projection for this vocab tile (lane-dense: TILE_V % 128 == 0).
    logits = jnp.dot(h_scratch[...], w_out_ref[...],
                     preferred_element_type=jnp.float32) + b_out_ref[...]
    o_ref[...] = logits


def seq2seq_forward_pallas(params, src_tokens, tgt_tokens, *, tile_v=128):
    src_emb = params["enc_emb"][src_tokens]          # (B, T_src, E)  glue gather
    tgt_emb = params["dec_emb"][tgt_tokens]          # (B, T_tgt, H)  glue gather
    w_enc, b_enc = params["w_enc"], params["b_enc"]
    w_out, b_out = params["w_out"], params["b_out"]

    B, T_src, E = src_emb.shape
    _, T_tgt, H = tgt_emb.shape
    V = w_out.shape[1]
    tile_v = min(tile_v, V)
    assert V % tile_v == 0, (V, tile_v)
    n_vt = V // tile_v

    return pl.pallas_call(
        _seq2seq_kernel,
        out_shape=jax.ShapeDtypeStruct((B, T_tgt, V), jnp.float32),
        grid_spec=pltpu.PrefetchScalarGridSpec(
            num_scalar_prefetch=0,
            grid=(B, n_vt),
            in_specs=[
                pl.BlockSpec((pl.Squeezed(), T_src, E), lambda b, j: (b, 0, 0)),
                pl.BlockSpec((pl.Squeezed(), T_tgt, H), lambda b, j: (b, 0, 0)),
                pl.BlockSpec((E, H), lambda b, j: (0, 0)),
                pl.BlockSpec((1, H), lambda b, j: (0, 0)),
                pl.BlockSpec((H, tile_v), lambda b, j: (0, j)),
                pl.BlockSpec((1, tile_v), lambda b, j: (0, j)),
            ],
            out_specs=pl.BlockSpec(
                (pl.Squeezed(), T_tgt, tile_v), lambda b, j: (b, 0, j)),
            scratch_shapes=[pltpu.VMEM((T_tgt, H), jnp.float32)],
        ),
        compiler_params=pltpu.CompilerParams(
            dimension_semantics=("parallel", "arbitrary")),
    )(src_emb, tgt_emb, w_enc, b_enc, w_out, b_out)


# ----------------------------------------------------------------------------
# Seq2Seq wrapper mirroring the PyTorch module's forward().
# ----------------------------------------------------------------------------
class Seq2SeqPallas:
    def __init__(self, params, tile_v=128):
        self.params = params
        self.tile_v = tile_v

    def forward_old(self, src, tgt):
        # encode -> bridge -> decode, fused into one kernel launch; the bridge
        # is an identity wrap of the encoder context, which never leaves VMEM.
        return seq2seq_forward_pallas(self.params, src, tgt, tile_v=self.tile_v)

    def forward(self, inputs, eval=None, regression=False):
        src = inputs[0][0]
        tgt = inputs[2]
        outputs = self.forward_old(src, tgt)
        if regression:
            # TODO(synk): MaxPool1d(10000) regression head requires vocab >= 10000;
            # not exercised at these synthetic shapes (default regression=False).
            raise NotImplementedError
        return outputs


# Pure-JAX reference for correctness checking.
def reference_forward(params, src, tgt):
    src_emb = params["enc_emb"][src]
    ctx = jnp.tanh(jnp.einsum("bte,eh->bth", src_emb, params["w_enc"])
                   + params["b_enc"][0])
    tgt_emb = params["dec_emb"][tgt]
    scores = jnp.einsum("bqh,bkh->bqk", tgt_emb, ctx)
    probs = jax.nn.softmax(scores, axis=-1)
    attn = jnp.einsum("bqk,bkh->bqh", probs, ctx)
    h = tgt_emb + attn
    return jnp.einsum("bqh,hv->bqv", h, params["w_out"]) + params["b_out"][0]


if __name__ == "__main__":
    B, T_SRC, T_TGT = 2, 8, 8
    E, H, V = 32, 32, 128

    key = jax.random.PRNGKey(0)
    k = jax.random.split(key, 8)
    params = {
        "enc_emb": (jax.random.normal(k[0], (V, E), jnp.float32) * 0.1),
        "dec_emb": (jax.random.normal(k[1], (V, H), jnp.float32) * 0.1),
        "w_enc":   (jax.random.normal(k[2], (E, H), jnp.float32) * 0.1),
        "b_enc":   (jax.random.normal(k[3], (1, H), jnp.float32) * 0.1),
        "w_out":   (jax.random.normal(k[4], (H, V), jnp.float32) * 0.1),
        "b_out":   (jax.random.normal(k[5], (1, V), jnp.float32) * 0.1),
    }

    src = jax.random.randint(k[6], (B, T_SRC), 0, V, dtype=jnp.int32)
    tgt = jax.random.randint(k[7], (B, T_TGT), 0, V, dtype=jnp.int32)

    # inputs mirrors the PyTorch calling convention: inputs[0][0]=src, inputs[2]=tgt
    inputs = ((src, None), None, tgt)

    model = Seq2SeqPallas(params)
    out = model.forward(inputs)
    out = jax.block_until_ready(out)

    ref = reference_forward(params, src, tgt)
    assert out.shape == (B, T_TGT, V), out.shape
    # Slightly looser tolerance: softmax denominator uses the EUP approximate
    # reciprocal (pl.reciprocal(approx=True)).
    assert jnp.allclose(out, ref, atol=2e-3, rtol=2e-3), (
        "mismatch vs reference, max abs err = %e"
        % float(jnp.max(jnp.abs(out - ref))))

    print("KERNEL_OK")
</pallas_src>

<mosaic_0001>
module attributes {stable_mosaic.version = 11 : i64} {
  func.func @_seq2seq_kernel(%arg0: i32, %arg1: i32, %arg2: memref<1x8x32xf32, #tpu.memory_space<vmem>>, %arg3: memref<1x8x32xf32, #tpu.memory_space<vmem>>, %arg4: memref<32x32xf32, #tpu.memory_space<vmem>>, %arg5: memref<1x32xf32, #tpu.memory_space<vmem>>, %arg6: memref<32x128xf32, #tpu.memory_space<vmem>>, %arg7: memref<1x128xf32, #tpu.memory_space<vmem>>, %arg8: memref<1x8x128xf32, #tpu.memory_space<vmem>>, %arg9: memref<8x32xf32, #tpu.memory_space<vmem>>) attributes {dimension_semantics = [#tpu.dimension_semantics<parallel>, #tpu.dimension_semantics<arbitrary>], iteration_bounds = array<i64: 2, 1>, scalar_prefetch = 0 : i64, scratch_operands = 1 : i64, tpu.core_type = #tpu.core_type<tc>, window_params = [{transform_indices = @transform_0, window_bounds = array<i64: 1, 8, 32>}, {transform_indices = @transform_1, window_bounds = array<i64: 1, 8, 32>}, {pipeline_mode = #tpu.pipeline_mode<synchronous>, transform_indices = @transform_2, window_bounds = array<i64: 32, 32>}, {pipeline_mode = #tpu.pipeline_mode<synchronous>, transform_indices = @transform_3, window_bounds = array<i64: 1, 32>}, {transform_indices = @transform_4, window_bounds = array<i64: 32, 128>}, {transform_indices = @transform_5, window_bounds = array<i64: 1, 128>}, {transform_indices = @transform_6, window_bounds = array<i64: 1, 8, 128>}]} {
    %c0_i32 = arith.constant 0 : i32
    %0 = arith.cmpi eq, %arg1, %c0_i32 : i32
    %1 = arith.extui %0 : i1 to i32
    %c0_i32_0 = arith.constant 0 : i32
    %2 = arith.cmpi ne, %1, %c0_i32_0 : i32
    scf.if %2 {
      %c0_9 = arith.constant 0 : index
      %c0_10 = arith.constant 0 : index
      %c0_11 = arith.constant 0 : index
      %12 = vector.load %arg2[%c0_9, %c0_10, %c0_11] : memref<1x8x32xf32, #tpu.memory_space<vmem>>, vector<1x8x32xf32>
      %13 = vector.shape_cast %12 : vector<1x8x32xf32> to vector<8x32xf32>
      %c0_12 = arith.constant 0 : index
      %c0_13 = arith.constant 0 : index
      %14 = vector.load %arg4[%c0_12, %c0_13] : memref<32x32xf32, #tpu.memory_space<vmem>>, vector<32x32xf32>
      %cst_14 = arith.constant dense<0.000000e+00> : vector<8x32xf32>
      %15 = tpu.matmul %13, %14, %cst_14 {dimension_numbers = #tpu.dot_dimension_numbers<[1], [0], [0], [1], [0, 0, 1, 1], [], []>} : vector<8x32xf32>, vector<32x32xf32>, vector<8x32xf32> -> vector<8x32xf32>
      %c0_15 = arith.constant 0 : index
      %c0_16 = arith.constant 0 : index
      %16 = vector.load %arg5[%c0_15, %c0_16] : memref<1x32xf32, #tpu.memory_space<vmem>>, vector<1x32xf32>
      %17 = vector.broadcast %16 : vector<1x32xf32> to vector<8x32xf32>
      %18 = arith.addf %15, %17 : vector<8x32xf32>
      %19 = math.tanh %18 : vector<8x32xf32>
      %c0_17 = arith.constant 0 : index
      %c0_18 = arith.constant 0 : index
      %c0_19 = arith.constant 0 : index
      %20 = vector.load %arg3[%c0_17, %c0_18, %c0_19] : memref<1x8x32xf32, #tpu.memory_space<vmem>>, vector<1x8x32xf32>
      %21 = vector.shape_cast %20 : vector<1x8x32xf32> to vector<8x32xf32>
      %cst_20 = arith.constant dense<0.000000e+00> : vector<8x8xf32>
      %22 = tpu.matmul %21, %19, %cst_20 {dimension_numbers = #tpu.dot_dimension_numbers<[1], [1], [0], [0], [0, 0, 1, 0], [], []>} : vector<8x32xf32>, vector<8x32xf32>, vector<8x8xf32> -> vector<8x8xf32>
      %cst_21 = arith.constant dense<0xFF800000> : vector<8xf32>
      %23 = vector.multi_reduction <maximumf>, %22, %cst_21 [1] : vector<8x8xf32> to vector<8xf32>
      %24 = vector.shape_cast %23 : vector<8xf32> to vector<8x1xf32>
      %25 = vector.broadcast %24 : vector<8x1xf32> to vector<8x8xf32>
      %26 = arith.subf %22, %25 : vector<8x8xf32>
      %27 = math.exp %26 : vector<8x8xf32>
      %cst_22 = arith.constant dense<0.000000e+00> : vector<8xf32>
      %28 = vector.multi_reduction <add>, %27, %cst_22 [1] : vector<8x8xf32> to vector<8xf32>
      %29 = vector.shape_cast %28 : vector<8xf32> to vector<8x1xf32>
      %30 = tpu.reciprocal %29 {approx = true} : vector<8x1xf32> -> vector<8x1xf32>
      %31 = vector.broadcast %30 : vector<8x1xf32> to vector<8x8xf32>
      %32 = arith.mulf %27, %31 : vector<8x8xf32>
      %cst_23 = arith.constant dense<0.000000e+00> : vector<8x32xf32>
      %33 = tpu.matmul %32, %19, %cst_23 {dimension_numbers = #tpu.dot_dimension_numbers<[1], [0], [0], [1], [0, 0, 1, 1], [], []>} : vector<8x8xf32>, vector<8x32xf32>, vector<8x32xf32> -> vector<8x32xf32>
      %34 = arith.addf %21, %33 : vector<8x32xf32>
      %c0_24 = arith.constant 0 : index
      %c0_25 = arith.constant 0 : index
      %35 = vector.load %arg9[%c0_24, %c0_25] : memref<8x32xf32, #tpu.memory_space<vmem>>, vector<8x32xf32>
      tpu.vector_store %arg9[%c0_24, %c0_25], %34 {strides = array<i32>} : memref<8x32xf32, #tpu.memory_space<vmem>>, vector<8x32xf32>,
    } else {
    }
    %c0 = arith.constant 0 : index
    %c0_1 = arith.constant 0 : index
    %3 = vector.load %arg9[%c0, %c0_1] : memref<8x32xf32, #tpu.memory_space<vmem>>, vector<8x32xf32>
    %c0_2 = arith.constant 0 : index
    %c0_3 = arith.constant 0 : index
    %4 = vector.load %arg6[%c0_2, %c0_3] : memref<32x128xf32, #tpu.memory_space<vmem>>, vector<32x128xf32>
    %cst = arith.constant dense<0.000000e+00> : vector<8x128xf32>
    %5 = tpu.matmul %3, %4, %cst {dimension_numbers = #tpu.dot_dimension_numbers<[1], [0], [0], [1], [0, 0, 1, 1], [], []>} : vector<8x32xf32>, vector<32x128xf32>, vector<8x128xf32> -> vector<8x128xf32>
    %c0_4 = arith.constant 0 : index
    %c0_5 = arith.constant 0 : index
    %6 = vector.load %arg7[%c0_4, %c0_5] : memref<1x128xf32, #tpu.memory_space<vmem>>, vector<1x128xf32>
    %7 = vector.broadcast %6 : vector<1x128xf32> to vector<8x128xf32>
    %8 = arith.addf %5, %7 : vector<8x128xf32>
    %c0_6 = arith.constant 0 : index
    %c0_7 = arith.constant 0 : index
    %c0_8 = arith.constant 0 : index
    %9 = vector.load %arg8[%c0_6, %c0_7, %c0_8] : memref<1x8x128xf32, #tpu.memory_space<vmem>>, vector<1x8x128xf32>
    %10 = vector.shape_cast %9 : vector<1x8x128xf32> to vector<8x128xf32>
    %11 = vector.shape_cast %8 : vector<8x128xf32> to vector<1x8x128xf32>
    tpu.vector_store %arg8[%c0_6, %c0_7, %c0_8], %11 {strides = array<i32>} : memref<1x8x128xf32, #tpu.memory_space<vmem>>, vector<1x8x128xf32>,
    return
  }
  func.func @transform_0(%arg0: i32, %arg1: i32) -> (i32, i32, i32) {
    %c0_i32 = arith.constant 0 : i32
    %c0_i32_0 = arith.constant 0 : i32
    %c0_i32_1 = arith.constant 0 : i32
    return %arg0, %c0_i32, %c0_i32_0 : i32, i32, i32
  }
  func.func @transform_1(%arg0: i32, %arg1: i32) -> (i32, i32, i32) {
    %c0_i32 = arith.constant 0 : i32
    %c0_i32_0 = arith.constant 0 : i32
    %c0_i32_1 = arith.constant 0 : i32
    return %arg0, %c0_i32, %c0_i32_0 : i32, i32, i32
  }
  func.func @transform_2(%arg0: i32, %arg1: i32) -> (i32, i32) {
    %c0_i32 = arith.constant 0 : i32
    %c0_i32_0 = arith.constant 0 : i32
    %c0_i32_1 = arith.constant 0 : i32
    return %c0_i32, %c0_i32_0 : i32, i32
  }
  func.func @transform_3(%arg0: i32, %arg1: i32) -> (i32, i32) {
    %c0_i32 = arith.constant 0 : i32
    %c0_i32_0 = arith.constant 0 : i32
    %c0_i32_1 = arith.constant 0 : i32
    return %c0_i32, %c0_i32_0 : i32, i32
  }
  func.func @transform_4(%arg0: i32, %arg1: i32) -> (i32, i32) {
    %c0_i32 = arith.constant 0 : i32
    %c0_i32_0 = arith.constant 0 : i32
    return %c0_i32, %arg1 : i32, i32
  }
  func.func @transform_5(%arg0: i32, %arg1: i32) -> (i32, i32) {
    %c0_i32 = arith.constant 0 : i32
    %c0_i32_0 = arith.constant 0 : i32
    return %c0_i32, %arg1 : i32, i32
  }
  func.func @transform_6(%arg0: i32, %arg1: i32) -> (i32, i32, i32) {
    %c0_i32 = arith.constant 0 : i32
    %c0_i32_0 = arith.constant 0 : i32
    return %arg0, %c0_i32, %arg1 : i32, i32, i32
  }
}

</mosaic_0001>

<bundles_post_ra>
// kernel: tpu_custom_call.1
= control target key start
LH: loop header
LB: loop body
LE: loop exit
PB: predicated region body
PF: predicated region fallthrough
CT: control target
= control target key end

     0   :  { %s1503_s0 = inlined_call_operand.hbm [shape: f32[2,8,32], index: 0, kind: input, shape index: {}]   ;;  %s1504_s1 = inlined_call_operand.hbm [shape: f32[2,8,32], index: 1, kind: input, shape index: {}]   ;;  %s1505_s2 = inlined_call_operand.hbm [shape: f32[32,32], index: 2, kind: input, shape index: {}]   ;;  %s1506_s3 = inlined_call_operand.vmem [shape: f32[1,32], index: 3, kind: input, shape index: {}]   ;;  %s1507_s4 = inlined_call_operand.hbm [shape: f32[32,128], index: 4, kind: input, shape index: {}]   ;;  %s1508_s5 = inlined_call_operand.vmem [shape: f32[1,128], index: 5, kind: input, shape index: {}]   ;;  %s1509_s6 = inlined_call_operand.hbm [shape: f32[2,8,128], index: 6, kind: output, shape index: {}]  }
   0x1   :  { %1511 = sst [smem:[#allocation17_spill]] %s1503_s0 }
   0x2   :  { %1512 = sst [smem:[#allocation18_spill]] %s1504_s1 }
   0x3   :  { %1513 = sst [smem:[#allocation19_spill]] %s1505_s2 }
   0x4   :  { %1514 = sst [smem:[#allocation20_spill]] %s1507_s4 }
   0x5   :  { %11 = vsyncpa [#allocation4], 0 }
   0x6   :  { %13 = vsyncpa [#allocation4 + $0x1], 0 }
   0x7   :  { %14 = vsyncpa [#allocation7], 0 }
   0x8   :  { %16 = vsyncpa [#allocation7 + $0x1], 0 }
   0x9   :  { %17 = vsyncpa [#allocation10], 0 }
   0xa   :  { %18 = vsyncpa [#allocation5], 0 }
   0xb   :  { %20 = vsyncpa [#allocation5 + $0x1], 0  ;;  %s1278_s21 = smov 0   ;;  %s1280_s22 = smov 0  }
   0xc   :  { %s1282_s23 = smov 0   ;;  %s1284_s24 = smov 0  }
   0xd   :  { %s1286_s25 = smov 0   ;;  %s1288_s26 = smov 0  }
   0xe LB: > { %s1309_s27 = sadd.s32 4294967295, %s1232_s26   ;;  %s861_s28 = sadd.s32 4294967294, %s1232_s26   ;;  %s1232_s26 = sphi %s1288_s26, %s26_s26   ;;  %s1228_s25 = sphi %s1286_s25, %s1536_s25   ;;  %s1224_s24 = sphi %s1284_s24, %s1535_s24   ;;  %s1220_s23 = sphi %s1282_s23, %s1534_s23   ;;  %s1216_s22 = sphi %s1280_s22, %s1533_s22   ;;  %s1212_s21 = sphi %s1278_s21, %s1532_s21  }
   0xf   : > { %p58_p0 = scmp.ne.s32.totalorder %s1216_s22, %s1212_s21  ;;  %p1510_p1 = scmp.eq.s32.totalorder %s1309_s27, 0 }
  0x10   : > { %p210_p3 = scmp.eq.s32.totalorder %s861_s28, 1  ;;  %p862_p5 = scmp.ge.s32.totalorder %s1232_s26, 1 }
  0x11   : > { %p1318_p4 = por %p1510_p1, %p58_p0  ;;  %p217_p7 = scmp.lt.s32.totalorder %s1232_s26, 3 }
  0x12   : > { %p1323_p6 = por %p210_p3, %p58_p0  ;;  %s1234_s8 = smov [#allocation8]  }
  0x13   : > { %p1328_p8 = pnand %p862_p5, %p217_p7  ;;  %s229_s9 = sshll.u32 %s1234_s8, 4  ;;  %s230_s9 = int_to_ptr.vmem [resolvable:$true] %s229_s9 }
  0x14   : > { %s1516_s30 = scalar_select %p1323_p6, 1, 0 }
  0x15   : > { %p948_p9 = pneg %p1328_p8  ;;  %s1235_s11 = smov [#allocation9]  }
  0x16   : > { %s247_s12 = sshll.u32 %s1235_s11, 4  ;;  %s1043_s13 = scalar_lea.vmem %s230_s9, 512  ;;  %s248_s12 = int_to_ptr.vmem [resolvable:$true] %s247_s12 }
  0x17   : > { %p1337_p11 = pnand %p948_p9, %p1510_p1  ;;  %p1044_p13 = scmp.ne.s32.totalorder %s230_s9, %s1043_s13 }
  0x18   : > { %p1051_p5 = scmp.lt.s32.totalorder %s230_s9, %s230_s9  ;;  %p1052_p7 = scmp.lt.s32.totalorder %s1043_s13, %s1043_s13 }
  0x19   : > { %p1034_p12 = pneg %p1337_p11 }
  0x1a   : > { %p1053_p10 = por %p1052_p7, %p1051_p5 }
  0x1b   : > { %p1046_p0 = pnand %p1044_p13, %p1034_p12 }
  0x1d   : > { %p1047_p3 = pneg %p1046_p0 }
  0x1f   : > { %p1054_p9 = pnand %p1053_p10, %p1047_p3 }
  0x21   : > { %1057 = shalt.err (!%p1054_p9)
}
  0x22   : > { %s1236_s14 = smov 128   ;;  %s1237_s15 = smov 8  }
  0x23   : > { %s1519_s2 = sld [smem:[#allocation19_spill]]  ;;  %s1069_s18 = scalar_lea.vmem %s248_s12, 512 }
  0x24   : > { %p1070_p1 = scmp.ne.s32.totalorder %s248_s12, %s1069_s18  ;;  %p1077_p2 = scmp.lt.s32.totalorder %s248_s12, %s248_s12 }
  0x25   : > { %p1078_p6 = scmp.lt.s32.totalorder %s1069_s18, %s1069_s18 }
  0x26   : > { %p1072_p13 = pnand %p1070_p1, %p1034_p12 }
  0x27   : > { %p1079_p5 = por %p1078_p6, %p1077_p2 }
  0x28   : > { %p1073_p0 = pneg %p1072_p13 }
  0x29   : > { %951 = dma.hbm_to_vmem [thread:$0]  (!%p1337_p11), %s1519_s2, 512, %s230_s9, [#allocation7], %s1236_s14, %s1236_s14, %s1237_s15  }
  0x2a   : > { %p1080_p10 = pnand %p1079_p5, %p1073_p0 }
  0x2c   : > { %1083 = shalt.err (!%p1080_p10)
}
  0x2d   : > { %s1520_s4 = sld [smem:[#allocation20_spill]]  ;;  %s38_s28 = sadd.s32 1, %s1228_s25 }
  0x2e   : > { %s45_s8 = sadd.s32 1, %s1220_s23  ;;  %p40_p1 = scmp.ge.s32.totalorder %s38_s28, 2 }
  0x2f   : > { %p52_p2 = scmp.ne.s32.totalorder %s1220_s23, %s1216_s22  ;;  %p53_p6 = scmp.eq.s32.totalorder %s1232_s26, 0 }
  0x30   : > { %p968_p12 = scmp.lt.s32.totalorder %s1232_s26, 2  ;;  %s1538_s28 = smov (%p40_p1, %s38_s28), 0 }
  0x31   : > { %p54_p3 = por %p53_p6, %p52_p2  ;;  %p1521_p7 = scmp.eq.s32.totalorder %s1309_s27, 1 }
  0x32   : > { %s42_s10 = ssub.s32 %s1228_s25, %s1538_s28  ;;  %s267_s11 = sand.u32 1, %s1220_s23  }
  0x33   : > { %954 = dma.hbm_to_vmem [thread:$0]  (!%p1337_p11), %s1520_s4, 512, %s248_s12, [#allocation10], %s1236_s14, %s1236_s14, %s1237_s15  }
  0x34   : > { %p1369_p9 = por %p1521_p7, %p52_p2  ;;  %p43_p13 = scmp.eq.s32.totalorder %s42_s10, 0 }
  0x35   : > { %s867_s12 = sshll.u32 %s267_s11, 3  ;;  %s868_s13 = sshll.u32 %s1228_s25, 7 }
  0x36   : > { %s1378_s14 = scalar_select %p43_p13, %s1220_s23, %s45_s8  }
  0x37   : > { %s1523_s0 = sld [smem:[#allocation17_spill]]  ;;  %s271_s18 = scalar_lea.vmem [#allocation3], %s867_s12 }
  0x38   : > { %s278_s19 = sshll.u32 %s271_s18, 4  ;;  %p1385_p11 = pnand %p968_p12, %p54_p3  ;;  %s279_s19 = int_to_ptr.vmem [resolvable:$true] %s278_s19 }
  0x39   : > { %s1525_s1 = sld [smem:[#allocation18_spill]]  ;;  %s268_s8 = scalar_lea.sflag [#allocation4], %s267_s11 }
  0x3a   : > { %p1086_p0 = pneg %p1385_p11  ;;  %s1097_s15 = scalar_lea.vmem %s279_s19, 128 }
  0x3b   : > { %p1098_p5 = scmp.ne.s32.totalorder %s279_s19, %s1097_s15  ;;  %s1238_s16 = smov [#allocation3]  }
  0x3c   : > { %s1102_s18 = sshll.u32 %s1238_s16, 4  ;;  %s1103_s18 = int_to_ptr.vmem [resolvable:$false] %s1102_s18 }
  0x3d   : > { %s276_s17 = scalar_lea.hbm %s1523_s0, %s868_s13  ;;  %p1100_p10 = pnand %p1098_p5, %p1086_p0 }
  0x3e   : > { %s1104_s0 = scalar_lea.vmem %s1103_s18, 256  ;;  %p1105_p2 = scmp.lt.s32.totalorder %s279_s19, %s1103_s18 }
  0x3f   : > { %s1392_s4 = scalar_lea.hbm %s1525_s1, %s868_s13  ;;  %p1101_p1 = pneg %p1100_p10 }
  0x40   : > { %p1106_p6 = scmp.lt.s32.totalorder %s1104_s0, %s1097_s15 }
  0x42   : > { %p1107_p12 = por %p1106_p6, %p1105_p2 }
  0x44   : > { %p1108_p3 = pnand %p1107_p12, %p1101_p1 }
  0x46   : > { %1111 = shalt.err (!%p1108_p3)
}
  0x47   : > { %958 = dma.hbm_to_vmem [thread:$0]  (!%p1385_p11), %s276_s17, 128, %s279_s19, %s268_s8  }
  0x48   : > { %s285_s2 = sand.u32 1, %s1232_s26   ;;  %s289_s11 = scalar_lea.vmem [#allocation6], %s867_s12 }
  0x49   : > { %s296_s13 = sshll.u32 %s289_s11, 4  ;;  %s286_s10 = scalar_lea.sflag [#allocation7], %s285_s2  ;;  %s297_s13 = int_to_ptr.vmem [resolvable:$true] %s296_s13 }
  0x4a   : > { %s1125_s1 = scalar_lea.vmem %s297_s13, 128  ;;  %s1239_s0 = smov [#allocation6]  }
  0x4b   : > { %p1126_p7 = scmp.ne.s32.totalorder %s297_s13, %s1125_s1  ;;  %s1130_s15 = sshll.u32 %s1239_s0, 4  ;;  %s1131_s15 = int_to_ptr.vmem [resolvable:$false] %s1130_s15 }
  0x4c   : > { %s1132_s16 = scalar_lea.vmem %s1131_s15, 256  ;;  %p1133_p10 = scmp.lt.s32.totalorder %s297_s13, %s1131_s15 }
  0x4d   : > { %p1128_p13 = pnand %p1126_p7, %p1086_p0  ;;  %p1134_p1 = scmp.lt.s32.totalorder %s1132_s16, %s1125_s1 }
  0x4f   : > { %p1129_p5 = pneg %p1128_p13  ;;  %p1135_p2 = por %p1134_p1, %p1133_p10 }
  0x51   : > { %p1136_p6 = pnand %p1135_p2, %p1129_p5 }
  0x53   : > { %1139 = shalt.err (!%p1136_p6)
}
  0x54   : > { %961 = dma.hbm_to_vmem [thread:$0]  (!%p1385_p11), %s1392_s4, 128, %s297_s13, %s286_s10  }
  0x55   : > { %305 = sbr.rel (%p1328_p8) target bundleno = 1238 (0x4d6), region = 44  ;;  %s1411_s12 = sand.u32 (!%p1328_p8), 1, %s1216_s22  }
  0x56   : > { %s1414_s17 = sshll.u32 (!%p1328_p8), %s1411_s12, 3  ;;  %s308_s1 = scalar_lea.sflag (!%p1328_p8), [#allocation4], %s1411_s12 }
  0x57   : > { %s311_s19 = scalar_lea.vmem (!%p1328_p8), [#allocation3], %s1414_s17 }
  0x5a   : > { %1191 = dma.done.wait (%p1318_p4), %s308_s1, 128  }
  0x5b   : > { %1193 = vsyncadd (%p1318_p4), %s308_s1, 4294967168  ;;  %s316_s4 = sand.u32 1, %s1309_s27   ;;  %s320_s20 = scalar_lea.vmem [#allocation6], %s1414_s17 }
  0x5c   : > { %s317_s7 = scalar_lea.sflag [#allocation7], %s316_s4 }
  0x5d   : > { %1195 = dma.done.wait (%p1318_p4), %s317_s7, 128  }
  0x5e   : > { %1197 = vsyncadd (%p1318_p4), %s317_s7, 4294967168  ;;  %p1526_p8 = scmp.eq.s32.totalorder %s1309_s27, 0 }
  0x60   : > { %1199 = dma.done.wait (%p1526_p8), [#allocation7], 512   ;;  %p1527_p11 = pmov %p1526_p8 }
  0x61   : > { %p1528_p0 = pmov %p1526_p8 }
  0x62   : > { %1201 = vsyncadd (%p1527_p11), [#allocation7], 4294966784 }
  0x63   : > { %1203 = dma.done.wait (%p1528_p0), [#allocation10], 512   ;;  %p1529_p12 = pmov %p1528_p0 }
  0x64   : > { %v1240_v0 = vmov 0.0   ;;  %vm1241_vm0 = vmmov 0   ;;  %v376_v1 = vld [vmem:[#allocation8 + $0x18] sm:$0xff]  ;;  %v375_v2 = vld [vmem:[#allocation8 + $0x10] sm:$0xff]  ;;  %v374_v3 = vld [vmem:[#allocation8 + $0x8] sm:$0xff]  ;;  %vm384_vm1 = vcmask 261120  }
  0x65   : > { %1205 = vsyncadd (%p1529_p12), [#allocation10], 4294966784  ;;  %902 = vmatprep.subr.mxu0 %v1240_v0  ;;  %910 = vmatprep.mubr.msk.f32.mxu0 %vm1241_vm0, %v1240_v0  ;;  %v373_v4 = vld [vmem:[#allocation8] sm:$0xff]  ;;  %v877_v6 = vld [vmem:[%s1506_s3] ss:$0 sm:$0xff]  ;;  %vm536_vm2 = vcmask 64512  }
  0x66   : > { %913 = vmatprep.subr.mxu1 %v1240_v0  ;;  %915 = vmatprep.mubr.msk.f32.mxu1 %vm1241_vm0, %v1240_v0  ;;  %v372_v5 = vld [vmem:[%s311_s19] sm:$0xff]  ;;  %v459_v11 = vld [vmem:[%s320_s20] sm:$0xff]  ;;  %s885_s2 = sshll.u32 %s1224_s24, 7  ;;  %s364_s11 = scalar_lea.vmem [#allocation11], %s1414_s17 }
  0x67   : > { %903 = vmatpush3.msra.mxu0 %v376_v1  ;;  %v627_v23 = vld [vmem:[#allocation9 + $0x18] sm:$0xff]  ;;  %v626_v24 = vld [vmem:[#allocation9 + $0x10] sm:$0xff]  ;;  %v625_v25 = vld [vmem:[#allocation9 + $0x8] sm:$0xff]  ;;  %s725_s13 = sshll.u32 %s364_s11, 4  ;;  %s1461_s15 = scalar_lea.hbm %s1509_s6, %s885_s2  ;;  %s726_s13 = int_to_ptr.vmem [resolvable:$true] %s725_s13 }
  0x68   : > { %904 = vmatprep.subr.mxu0 %v1240_v0  ;;  %v624_v26 = vld [vmem:[#allocation9] sm:$0xff]  ;;  %v882_v31 = vld [vmem:[%s1508_s5] ss:$0 sm:$0xff]  ;;  %s711_s16 = scalar_lea.sflag [#allocation5], %s1411_s12  ;;  %s1140_s1 = scalar_lea.vmem %s726_s13, 128 }
  0x69   : > { %905 = vmatpush3.msra.mxu0 %v375_v2  ;;  %p1141_p4 = scmp.ne.s32.totalorder %s726_s13, %s1140_s1  ;;  %s1242_s19 = smov [#allocation11]  }
  0x6a   : > { %906 = vmatprep.subr.mxu0 %v1240_v0  ;;  %s1144_s24 = sshll.u32 %s1242_s19, 4  ;;  %s1145_s24 = int_to_ptr.vmem [resolvable:$false] %s1144_s24 }
  0x6b   : > { %907 = vmatpush3.msra.mxu0 %v374_v3  ;;  %p1142_p3 = pnand %p1141_p4, %p1369_p9  ;;  %s1146_s17 = scalar_lea.vmem %s1145_s24, 256 }
  0x6c   : > { %908 = vmatprep.subr.mxu0 %v1240_v0  ;;  %p1147_p13 = scmp.lt.s32.totalorder %s726_s13, %s1145_s24  ;;  %p1148_p5 = scmp.lt.s32.totalorder %s1146_s17, %s1140_s1 }
  0x6d   : > { %909 = vmatpush3.msra.mxu0 %v373_v4  ;;  %p1143_p7 = pneg %p1142_p3 }
  0x6e   : > { %911 = vmatmul.mubr.msk.f32.vlgmr.msra.gmra.mxu0 %vm384_vm1, %v372_v5  ;;  %923 = vmatprep.subr.mxu0 %v1240_v0  ;;  %p1149_p10 = por %p1148_p5, %p1147_p13 }
  0x6f   : > { %931 = vmatprep.mubr.msk.f32.mxu0 %vm1241_vm0, %v1240_v0  ;;  %924 = vmatpush3.msra.mxu0 %v627_v23 }
  0x70   : > { %925 = vmatprep.subr.mxu0 %v1240_v0  ;;  %p1150_p1 = pnand %p1149_p10, %p1143_p7 }
  0x71   : > { %926 = vmatpush3.msra.mxu0 %v626_v24 }
  0x72   : > { %927 = vmatprep.subr.mxu0 %v1240_v0 }
  0x73   : > { %928 = vmatpush3.msra.mxu0 %v625_v25 }
  0x74   : > { %929 = vmatprep.subr.mxu0 %v1240_v0 }
  0x75   : > { %930 = vmatpush3.msra.mxu0 %v624_v26 }
 0x12e   : > { %v454_v7 = vpop.f32.mrf.mxu0 }
 0x12f   : > { %v455_v8 = vadd.f32 %v877_v6, %v454_v7 }
 0x130   : > { %v912_v9 = vpop.f32.mrf.mxu0 }
 0x131   : > { %1026 = vtanh.f32 %v455_v8 }
 0x13e   : > { %v1027_v10 = vpop.eup %1026 }
 0x13f   : > { %914 = vmatpush3.xpose.msk.msra.mxu1 %vm384_vm1, %v1027_v10 }
 0x140   : > { %918 = vmatprep.subr.mxu1 %v1240_v0 }
 0x142   : > { %916 = vmatmul.mubr.msk.f32.vlgmr.msra.gmra.mxu1 %vm384_vm1, %v459_v11 }
 0x143   : > { %919 = vmatpush3.msra.mxu1 %v1027_v10  ;;  %920 = vmatprep.mubr.msk.f32.mxu1 %vm1241_vm0, %v1240_v0 }
 0x202   : > { %v532_v12 = vpop.f32.mrf.mxu1 }
 0x203   : > { %v537_v13 = vsel %vm536_vm2, %v532_v12, -inf }
 0x204   : > { %538 = vmax.xlane.f32.xlu0 %v537_v13  ;;  %v917_v14 = vpop.f32.mrf.mxu1 }
 0x28d   : > { %v539_v15 = vpop.xlane.xlu0 %538 }
 0x28e   : > { %v540_v16 = vsub.f32 %v532_v12, %v539_v15 }
 0x290   : > { %v541_v17 = vmul.f32 1.442695, %v540_v16 }
 0x292   : > { %1028 = vpow2.f32 %v541_v17 }
 0x29f   : > { %v1029_v18 = vpop.eup %1028 }
 0x2a0   : > { %v543_v19 = vsel %vm536_vm2, %v1029_v18, 0.0 }
 0x2a1   : > { %544 = vadd.xlane.f32.xlu0 %v543_v19 }
 0x32a   : > { %v545_v20 = vpop.xlane.xlu0 %544 }
 0x32b   : > { %1030 = vrcp.f32 %v545_v20 }
 0x338   : > { %v1031_v21 = vpop.eup %1030 }
 0x339   : > { %v547_v22 = vmul.f32 %v1031_v21, %v1029_v18 }
 0x33b   : > { %921 = vmatmul.mubr.msk.f32.vlgmr.msra.gmra.mxu1 %vm536_vm2, %v547_v22 }
 0x3fb   : > { %v617_v27 = vpop.f32.mrf.mxu1 }
 0x3fc   : > { %v621_v28 = vadd.f32 %v617_v27, %v459_v11 }
 0x3fd   : > { %v922_v29 = vpop.f32.mrf.mxu1 }
 0x3fe   : > { %622 = vst.msk [vmem:[#allocation2] sm:$0xff] %vm384_vm1, %v621_v28 }
 0x405   : > { %v623_v30 = vld [vmem:[#allocation2] sm:$0xff] }
 0x406   : > { %932 = vmatmul.mubr.msk.f32.vlgmr.msra.gmra.mxu0 %vm384_vm1, %v623_v30 }
 0x4c6   : > { %v705_v32 = vpop.f32.mrf.mxu0 }
 0x4c7   : > { %v706_v33 = vadd.f32 %v882_v31, %v705_v32 }
 0x4c8   : > { %v933_v34 = vpop.f32.mrf.mxu0 }
 0x4c9   : > { %709 = vst [vmem:[%s364_s11] sm:$0xff] %v706_v33 }
 0x4ca   : > { %1153 = shalt.err (!%p1150_p1)
}
 0x4cb   : > { %s1154_s4 = scalar_lea.hbm %s1461_s15, 128  ;;  %s1158_s20 = scalar_lea.hbm %s1509_s6, 256 }
 0x4cc   : > { %p1155_p2 = scmp.ne.s32.totalorder %s1461_s15, %s1154_s4  ;;  %p1159_p11 = scmp.lt.s32.totalorder %s1461_s15, %s1509_s6 }
 0x4cd   : > { %p1160_p0 = scmp.lt.s32.totalorder %s1158_s20, %s1154_s4 }
 0x4ce   : > { %p1156_p6 = pnand %p1155_p2, %p1369_p9 }
 0x4cf   : > { %p1161_p12 = por %p1160_p0, %p1159_p11 }
 0x4d0   : > { %p1157_p8 = pneg %p1156_p6 }
 0x4d2   : > { %p1162_p4 = pnand %p1161_p12, %p1157_p8 }
 0x4d4   : > { %1165 = shalt.err (!%p1162_p4)
}
 0x4d5   : > { %946 = dma.vmem_to_hbm [thread:$0]  (%p1369_p9), %s726_s13, 128, %s1461_s15, %s711_s16  }
 0x4d6 PF: > { %s737_s8 = sand.u32 1, %s1212_s21   ;;  %p1530_p3 = scmp.ne.s32.totalorder %s1516_s30, 0 }
 0x4d7   : > { %p1531_p7 = scmp.ge.s32.totalorder %s1232_s26, 2  ;;  %s738_s18 = scalar_lea.sflag [#allocation5], %s737_s8 }
 0x4d9   : > { %p963_p13 = pnand %p1531_p7, %p1530_p3 }
 0x4db   : > { %p964_p5 = pneg %p963_p13 }
 0x4dd   : > { %1207 = dma.done.wait (%p964_p5), %s738_s18, 128  }
 0x4de   : > { %1209 = vsyncadd (%p964_p5), %s738_s18, 4294967168  ;;  %s26_s26 = sadd.s32 1, %s1232_s26   ;;  %s1532_s21 = smov %s1216_s22 }
 0x4df   : > { %p23_p10 = scmp.ge.s32.totalorder %s26_s26, 4   ;;  %s1533_s22 = smov %s1220_s23 }
 0x4e0   : > { %s1534_s23 = smov %s1378_s14  ;;  %s1535_s24 = smov %s1228_s25 }
 0x4e1   : > { %s1536_s25 = smov %s1538_s28  ;;  %25 = sbr.rel (!%p23_p10) target bundleno = 14 (0xe), region = 118 }
 0x4e6   :  { %743 = vsyncpa [#allocation4], 1 }
 0x4e7   :  { %745 = vsyncpa [#allocation4 + $0x1], 1 }
 0x4e8   :  { %746 = vsyncpa [#allocation7], 1 }
 0x4e9   :  { %748 = vsyncpa [#allocation7 + $0x1], 1 }
 0x4ea   :  { %749 = vsyncpa [#allocation10], 1 }
 0x4eb   :  { %750 = vsyncpa [#allocation5], 1 }
 0x4ec   :  { %752 = vsyncpa [#allocation5 + $0x1], 1 }

</bundles_post_ra>
